<compile_context>
chip_gen: v5e
topology: v5e:2x2
jax: 0.10.0
libtpu: 0.0.40
codegen_flags: <defaults>
</compile_context>

<pallas_src>
from functools import partial

import jax
import jax.numpy as jnp
from jax.experimental import pallas as pl
from jax.experimental.pallas import tpu as pltpu


# ---------------------------------------------------------------------------
# Kernels
# ---------------------------------------------------------------------------

def _focal_tail(log_pt, ce, gamma: float):
    """Apply the static-gamma focal factor to the (already weighted) CE term."""
    if gamma == 0.0:
        return ce                                   # plain (weighted) CE
    pt = jnp.exp(log_pt)
    one_m_pt = 1.0 - pt
    if float(gamma).is_integer() and 0 < gamma <= 8:
        f = one_m_pt
        for _ in range(int(gamma) - 1):             # cheap integer power (VPU)
            f = f * one_m_pt
    else:
        f = one_m_pt ** jnp.float32(gamma)          # general pow (EUP path)
    return f * ce


def _focal_kernel_cl(x_ref, y_ref, alpha_ref, out_ref, *,
                     gamma: float, ignore_index: int, l_valid: int,
                     use_alpha: bool):
    """Classes on sublanes, positions lane-dense: logits block is (1, C, TL)."""
    t = pl.program_id(1)
    c, tl = x_ref.shape[1], x_ref.shape[2]

    x = x_ref[0].astype(jnp.float32)                # (C, TL)
    y = y_ref[0]                                    # (1, TL) int32 labels

    # valid = real position (ragged lane tail) AND label != ignore_index.
    # NOTE: the ragged tail reads unspecified lanes; every cross-lane reduction
    # below happens only AFTER this mask / the log_pt clamp -- keep it that way.
    pos = t * tl + jax.lax.broadcasted_iota(jnp.int32, (1, tl), 1)
    valid = jnp.logical_and(pos < l_valid, y != ignore_index)     # (1, TL)

    # log-softmax pieces over the class (sublane) axis.  log_p = z - lse is
    # never materialized as a full (C, TL) tensor: select the target logit
    # first with a single bool mask, then work on (1, TL) data.
    m = jnp.max(x, axis=0, keepdims=True)                         # (1, TL)
    z = x - m                                                     # (C, TL)
    lse = jnp.log(jnp.sum(jnp.exp(z), axis=0, keepdims=True))     # (1, TL)

    mask = jax.lax.broadcasted_iota(jnp.int32, (c, tl), 0) == y   # (C, TL) bool
    zt = jnp.sum(jnp.where(mask, z, 0.0), axis=0, keepdims=True)  # (1, TL)
    log_pt = zt - lse
    # Clamp invalid lanes so exp/pow never see garbage (pt==1, 0**0, NaN).
    log_pt = jnp.where(valid, log_pt, -1.0)

    if use_alpha:
        alpha = alpha_ref[...].astype(jnp.float32)                # (C, 1)
        w = jnp.sum(jnp.where(mask, alpha, 0.0), axis=0, keepdims=True)
        ce = -w * log_pt                                          # NLLLoss(weight=alpha)
    else:
        ce = -log_pt

    loss = jnp.where(valid, _focal_tail(log_pt, ce, gamma), 0.0)

    # One packed lane-dense output block per grid step:
    #   sublane 0 = partial loss sum, sublane 1 = valid-position count.
    sub = jax.lax.broadcasted_iota(jnp.int32, out_ref.shape, 2)
    out_ref[...] = jnp.where(sub == 0, jnp.sum(loss),
                             jnp.sum(valid.astype(jnp.float32)))


def _focal_kernel_rc(x_ref, y_ref, alpha_ref, out_ref, *,
                     gamma: float, ignore_index: int, n_valid: int,
                     use_alpha: bool):
    """Rows on sublanes, classes on lanes: logits block is (TR, C).

    Used for the 2-D (N, C) classification path when C >= 128, so the wrapper
    never has to transpose the logits in HBM."""
    i = pl.program_id(0)
    tr, c = x_ref.shape

    x = x_ref[...].astype(jnp.float32)              # (TR, C)
    y = y_ref[...]                                  # (TR, 1) int32 labels

    rows = i * tr + jax.lax.broadcasted_iota(jnp.int32, (tr, 1), 0)
    valid = jnp.logical_and(rows < n_valid, y != ignore_index)    # (TR, 1)

    m = jnp.max(x, axis=1, keepdims=True)                         # (TR, 1)
    z = x - m
    lse = jnp.log(jnp.sum(jnp.exp(z), axis=1, keepdims=True))     # (TR, 1)

    mask = jax.lax.broadcasted_iota(jnp.int32, (tr, c), 1) == y   # (TR, C) bool
    zt = jnp.sum(jnp.where(mask, z, 0.0), axis=1, keepdims=True)  # (TR, 1)
    log_pt = jnp.where(valid, zt - lse, -1.0)

    if use_alpha:
        alpha = alpha_ref[...].astype(jnp.float32)                # (1, C)
        w = jnp.sum(jnp.where(mask, alpha, 0.0), axis=1, keepdims=True)
        ce = -w * log_pt
    else:
        ce = -log_pt

    loss = jnp.where(valid, _focal_tail(log_pt, ce, gamma), 0.0)

    sub = jax.lax.broadcasted_iota(jnp.int32, out_ref.shape, 1)
    out_ref[...] = jnp.where(sub == 0, jnp.sum(loss),
                             jnp.sum(valid.astype(jnp.float32)))


# ---------------------------------------------------------------------------
# Tile-size / VMEM helpers
# ---------------------------------------------------------------------------

def _round_up(v: int, m: int) -> int:
    return ((v + m - 1) // m) * m


def _round_down(v: int, m: int) -> int:
    return max(m, (v // m) * m)


def _vmem_capacity_bytes() -> int:
    """Per-TensorCore VMEM capacity; conservative (v7x) fallback if unknown."""
    try:
        cap = int(pltpu.get_tpu_info().vmem_capacity_bytes)
        if cap > 0:
            return cap
    except Exception:
        pass
    return 64 * 1024 * 1024


def _pick_lane_tile(l: int, c: int, f32_block_budget: int) -> int:
    """Largest multiple-of-128 lane tile whose f32 (C_pad, TL) working block
    stays within the per-generation budget (above the ~1-4 MiB DMA knee)."""
    c_pad = _round_up(c, 8)                 # sublane padding of the (C, TL) block
    tl = (f32_block_budget // 4) // c_pad
    tl = _round_down(tl, 128)
    l_pad = _round_up(l, 128)
    return max(128, min(tl, l_pad))


def _pick_row_tile(n: int, c: int, f32_block_budget: int) -> int:
    """Row tile (multiple of 8) for the (N, C) direct path; keeps >=2 grid
    steps when possible so v7x megacore can shard the 'parallel' axis."""
    c_pad = _round_up(c, 128)               # lane padding of the (TR, C) block
    tr = (f32_block_budget // 4) // c_pad
    tr = min(_round_down(tr, 8), _round_down(n, 8))
    tr = max(8, tr)
    if -(-n // tr) < 2 and n >= 16:
        tr = max(8, _round_down(n // 2, 8))
    return tr


# ---------------------------------------------------------------------------
# Wrapper
# ---------------------------------------------------------------------------

def focal_loss(x, y, alpha=None, gamma: float = 0.0,
               ignore_index: int = -100, reduction: str = "mean"):
    """Pallas FocalLoss forward. Supports reduction in {'mean', 'sum'}.

    Keep logits in bf16 in HBM when possible -- the kernel upcasts in VMEM and
    the wrapper never pre-casts, so bf16 halves HBM traffic on every gen."""
    if reduction not in ("mean", "sum"):
        # TODO(synk): reduction='none' in the PyTorch module returns only the
        # un-ignored rows (data-dependent output shape) -- no clean Pallas
        # equivalent; only 'mean' and 'sum' are implemented.
        raise ValueError("reduction must be 'mean' or 'sum'")

    vmem_cap = _vmem_capacity_bytes()
    # Per-block f32 working-set budget: ~4 MiB on 64-MiB parts (v7x), ~8 MiB on
    # 128-MiB parts (v5e / v6e) -- leaves room for double-buffered inputs plus
    # the handful of elementwise temporaries.
    block_budget = max(2 << 20, min(8 << 20, vmem_cap // 16))

    use_alpha = alpha is not None

    if x.ndim == 2 and int(x.shape[1]) >= 128 and int(x.shape[0]) >= 8:
        # ---- (N, C) classification with lanes well utilized: consume logits
        # directly (rows on sublanes, classes on lanes) -- no HBM transpose. ----
        n, c = int(x.shape[0]), int(x.shape[1])
        y2 = y.reshape(n, 1).astype(jnp.int32)
        alpha2 = (jnp.asarray(alpha, jnp.float32) if use_alpha
                  else jnp.ones((c,), jnp.float32)).reshape(1, c)
        itemsize = jnp.dtype(x.dtype).itemsize

        tr = _pick_row_tile(n, c, block_budget)
        nr = pl.cdiv(n, tr)

        c_lane_pad = _round_up(c, 128)
        x_vmem = tr * c_lane_pad * itemsize           # padded input buffer
        y_vmem = tr * 128 * 4                         # (TR, 1) int32, lane-padded
        tmp_vmem = tr * c_lane_pad * 4                # f32 elementwise temps
        need = 2 * (x_vmem + y_vmem) + 4 * tmp_vmem + (2 << 20)
        vmem_limit = int(min(int(0.9 * vmem_cap), max(16 << 20, need)))

        kernel = partial(_focal_kernel_rc, gamma=float(gamma),
                         ignore_index=int(ignore_index), n_valid=n,
                         use_alpha=use_alpha)
        parts = pl.pallas_call(
            kernel,
            out_shape=jax.ShapeDtypeStruct((nr, 2, 128), jnp.float32),
            grid_spec=pltpu.PrefetchScalarGridSpec(
                num_scalar_prefetch=0,
                grid=(nr,),
                in_specs=[
                    pl.BlockSpec((tr, c), lambda i: (i, 0)),     # logits
                    pl.BlockSpec((tr, 1), lambda i: (i, 0)),     # labels
                    pl.BlockSpec((1, c), lambda i: (0, 0)),      # alpha (resident)
                ],
                out_specs=pl.BlockSpec((1, 2, 128), lambda i: (i, 0, 0)),
            ),
            compiler_params=pltpu.CompilerParams(
                dimension_semantics=("parallel",),
                vmem_limit_bytes=vmem_limit),
        )(x, y2, alpha2)
        total = jnp.sum(parts[:, 0, 0])
        count = jnp.sum(parts[:, 1, 0])
    else:
        if x.ndim > 2:
            # NCHW (N, C, d1..dK) -> (N, C, prod(d)): contiguity-preserving
            # reshape, no HBM transpose pass.
            b, c = int(x.shape[0]), int(x.shape[1])
            l = 1
            for d in x.shape[2:]:
                l *= int(d)
            x3 = x.reshape(b, c, l)
            y3 = y.reshape(b, 1, l).astype(jnp.int32)
        else:
            # Tiny-C / tiny-N (N, C) classification: a rows-on-sublanes kernel
            # would waste >90% of every 128-lane vreg, so eat one small
            # transpose and reuse the lane-dense classes-on-sublanes kernel.
            b, c, l = 1, int(x.shape[1]), int(x.shape[0])
            x3 = jnp.transpose(x, (1, 0)).reshape(1, c, l)
            y3 = y.reshape(1, 1, l).astype(jnp.int32)

        alpha2 = (jnp.asarray(alpha, jnp.float32) if use_alpha
                  else jnp.ones((c,), jnp.float32)).reshape(c, 1)
        itemsize = jnp.dtype(x3.dtype).itemsize

        tl = _pick_lane_tile(l, c, block_budget)
        nt = pl.cdiv(l, tl)
        l_pad = _round_up(l, 128)
        if b * nt < 2 and l_pad >= 256:
            # Keep >= 2 grid steps so v7x megacore has something to shard.
            tl = _round_down(l_pad // 2, 128)
            nt = pl.cdiv(l, tl)

        c_sub_pad = _round_up(c, 8)
        x_vmem = c_sub_pad * tl * itemsize            # padded input buffer
        y_vmem = 8 * tl * 4                           # (1, TL) int32, sublane-padded
        tmp_vmem = c_sub_pad * tl * 4                 # f32 elementwise temps
        need = 2 * (x_vmem + y_vmem) + 4 * tmp_vmem + (2 << 20)
        vmem_limit = int(min(int(0.9 * vmem_cap), max(16 << 20, need)))
        # TODO(synk): for very large class counts (C*128*4B beyond a few MiB) a
        # C-tiled online-LSE variant (running max / sum-exp scratch, C as an
        # 'arbitrary' grid axis) would keep blocks 2-deep pipelined; not needed
        # for the segmentation-style shapes this module targets.

        kernel = partial(_focal_kernel_cl, gamma=float(gamma),
                         ignore_index=int(ignore_index), l_valid=int(l),
                         use_alpha=use_alpha)
        parts = pl.pallas_call(
            kernel,
            out_shape=jax.ShapeDtypeStruct((b, nt, 2, 128), jnp.float32),
            grid_spec=pltpu.PrefetchScalarGridSpec(
                num_scalar_prefetch=0,
                grid=(b, nt),
                in_specs=[
                    pl.BlockSpec((1, c, tl), lambda i, j: (i, 0, j)),   # logits
                    pl.BlockSpec((1, 1, tl), lambda i, j: (i, 0, j)),   # labels
                    pl.BlockSpec((c, 1), lambda i, j: (0, 0)),          # alpha (resident)
                ],
                out_specs=pl.BlockSpec((1, 1, 2, 128),
                                       lambda i, j: (i, j, 0, 0)),
            ),
            compiler_params=pltpu.CompilerParams(
                dimension_semantics=("parallel", "parallel"),
                vmem_limit_bytes=vmem_limit),
        )(x3, y3, alpha2)
        total = jnp.sum(parts[:, :, 0, 0])
        count = jnp.sum(parts[:, :, 1, 0])

    if reduction == "sum":
        return total
    # 'mean' over un-ignored positions; returns 0.0 when everything is ignored,
    # matching the PyTorch module's early-return of torch.tensor(0.0).
    return jnp.where(count > 0.0, total / jnp.maximum(count, 1.0),
                     jnp.float32(0.0))


# ---------------------------------------------------------------------------
# Plain-JAX reference (mirrors the PyTorch module, reduction='mean')
# ---------------------------------------------------------------------------

def _focal_loss_reference(x, y, alpha, gamma, ignore_index):
    if x.ndim > 2:
        c = x.shape[1]
        x = jnp.transpose(x, (0,) + tuple(range(2, x.ndim)) + (1,)).reshape(-1, c)
        y = y.reshape(-1)
    mask = (y != ignore_index)
    log_p = jax.nn.log_softmax(x.astype(jnp.float32), axis=-1)
    y_safe = jnp.where(mask, y, 0)
    log_pt = jnp.take_along_axis(log_p, y_safe[:, None], axis=-1)[:, 0]
    w = alpha[y_safe] if alpha is not None else jnp.ones_like(log_pt)
    ce = -w * log_pt
    pt = jnp.exp(log_pt)
    loss = ((1.0 - pt) ** gamma) * ce
    maskf = mask.astype(jnp.float32)
    return jnp.sum(loss * maskf) / jnp.maximum(jnp.sum(maskf), 1.0)


if __name__ == "__main__":
    key = jax.random.PRNGKey(0)
    k1, k2, k3, k4 = jax.random.split(key, 4)

    ignore_index = -100

    # --- Dense / segmentation NCHW case (classes-on-sublanes kernel) --------
    N, C, H, W = 2, 4, 16, 16
    gamma = 2.0
    x = jax.random.normal(k1, (N, C, H, W), dtype=jnp.float32)
    y = jax.random.randint(k2, (N, H, W), 0, C, dtype=jnp.int32)
    y = jnp.where((jnp.arange(N * H * W).reshape(N, H, W) % 13) == 0,
                  jnp.int32(ignore_index), y)
    alpha = jnp.array([0.25, 0.5, 0.75, 1.0], dtype=jnp.float32)

    loss = jax.block_until_ready(
        focal_loss(x, y, alpha=alpha, gamma=gamma, ignore_index=ignore_index))
    ref = _focal_loss_reference(x, y, alpha, gamma, ignore_index)
    assert jnp.allclose(loss, ref, rtol=1e-4, atol=1e-5), (loss, ref)

    # --- (N, C) classification with C >= 128 (rows-on-sublanes kernel, no
    #     wrapper transpose), non-integer gamma, no alpha -------------------
    N2, C2 = 64, 256
    x2 = jax.random.normal(k3, (N2, C2), dtype=jnp.float32)
    y2 = jax.random.randint(k4, (N2,), 0, C2, dtype=jnp.int32)
    y2 = jnp.where((jnp.arange(N2) % 11) == 0, jnp.int32(ignore_index), y2)

    loss2 = jax.block_until_ready(
        focal_loss(x2, y2, alpha=None, gamma=1.5, ignore_index=ignore_index))
    ref2 = _focal_loss_reference(x2, y2, None, 1.5, ignore_index)
    assert jnp.allclose(loss2, ref2, rtol=1e-4, atol=1e-5), (loss2, ref2)

    print("KERNEL_OK")
</pallas_src>

<mosaic_0001>
module attributes {stable_mosaic.version = 11 : i64} {
  func.func @_focal_kernel_cl(%arg0: i32, %arg1: i32, %arg2: memref<1x4x256xf32, #tpu.memory_space<vmem>>, %arg3: memref<1x1x256xi32, #tpu.memory_space<vmem>>, %arg4: memref<4x1xf32, #tpu.memory_space<vmem>>, %arg5: memref<1x1x2x128xf32, #tpu.memory_space<vmem>>) attributes {dimension_semantics = [#tpu.dimension_semantics<parallel>, #tpu.dimension_semantics<parallel>], iteration_bounds = array<i64: 2, 1>, scalar_prefetch = 0 : i64, scratch_operands = 0 : i64, tpu.core_type = #tpu.core_type<tc>, window_params = [{transform_indices = @transform_0, window_bounds = array<i64: 1, 4, 256>}, {transform_indices = @transform_1, window_bounds = array<i64: 1, 1, 256>}, {pipeline_mode = #tpu.pipeline_mode<synchronous>, transform_indices = @transform_2, window_bounds = array<i64: 4, 1>}, {transform_indices = @transform_3, window_bounds = array<i64: 1, 1, 2, 128>}]} {
    %c0 = arith.constant 0 : index
    %c0_0 = arith.constant 0 : index
    %c0_1 = arith.constant 0 : index
    %0 = vector.load %arg2[%c0, %c0_0, %c0_1] : memref<1x4x256xf32, #tpu.memory_space<vmem>>, vector<1x4x256xf32>
    %1 = vector.shape_cast %0 : vector<1x4x256xf32> to vector<4x256xf32>
    %c0_2 = arith.constant 0 : index
    %c0_3 = arith.constant 0 : index
    %c0_4 = arith.constant 0 : index
    %2 = vector.load %arg3[%c0_2, %c0_3, %c0_4] : memref<1x1x256xi32, #tpu.memory_space<vmem>>, vector<1x1x256xi32>
    %3 = vector.shape_cast %2 : vector<1x1x256xi32> to vector<1x256xi32>
    %c256_i32 = arith.constant 256 : i32
    %4 = arith.muli %arg1, %c256_i32 : i32
    %5 = tpu.iota {dimensions = array<i32: 1>} : vector<1x256xi32>
    %6 = vector.broadcast %4 : i32 to vector<1x256xi32>
    %7 = arith.addi %6, %5 : vector<1x256xi32>
    %c256_i32_5 = arith.constant 256 : i32
    %8 = vector.broadcast %c256_i32_5 : i32 to vector<1x256xi32>
    %9 = arith.cmpi slt, %7, %8 : vector<1x256xi32>
    %c-100_i32 = arith.constant -100 : i32
    %10 = vector.broadcast %c-100_i32 : i32 to vector<1x256xi32>
    %11 = arith.cmpi ne, %3, %10 : vector<1x256xi32>
    %12 = arith.andi %9, %11 : vector<1x256xi1>
    %cst = arith.constant dense<0xFF800000> : vector<256xf32>
    %13 = vector.multi_reduction <maximumf>, %1, %cst [0] : vector<4x256xf32> to vector<256xf32>
    %14 = vector.shape_cast %13 : vector<256xf32> to vector<1x256xf32>
    %15 = vector.broadcast %14 : vector<1x256xf32> to vector<4x256xf32>
    %16 = arith.subf %1, %15 : vector<4x256xf32>
    %17 = math.exp %16 : vector<4x256xf32>
    %cst_6 = arith.constant dense<0.000000e+00> : vector<256xf32>
    %18 = vector.multi_reduction <add>, %17, %cst_6 [0] : vector<4x256xf32> to vector<256xf32>
    %19 = vector.shape_cast %18 : vector<256xf32> to vector<1x256xf32>
    %20 = math.log %19 : vector<1x256xf32>
    %21 = tpu.iota {dimensions = array<i32: 0>} : vector<4x256xi32>
    %22 = vector.broadcast %3 : vector<1x256xi32> to vector<4x256xi32>
    %23 = arith.cmpi eq, %21, %22 : vector<4x256xi32>
    %cst_7 = arith.constant 0.000000e+00 : f32
    %24 = vector.broadcast %cst_7 : f32 to vector<4x256xf32>
    %25 = arith.select %23, %16, %24 : vector<4x256xi1>, vector<4x256xf32>
    %cst_8 = arith.constant dense<0.000000e+00> : vector<256xf32>
    %26 = vector.multi_reduction <add>, %25, %cst_8 [0] : vector<4x256xf32> to vector<256xf32>
    %27 = vector.shape_cast %26 : vector<256xf32> to vector<1x256xf32>
    %28 = arith.subf %27, %20 : vector<1x256xf32>
    %cst_9 = arith.constant -1.000000e+00 : f32
    %29 = vector.broadcast %cst_9 : f32 to vector<1x256xf32>
    %30 = arith.select %12, %28, %29 : vector<1x256xi1>, vector<1x256xf32>
    %c0_10 = arith.constant 0 : index
    %c0_11 = arith.constant 0 : index
    %31 = vector.load %arg4[%c0_10, %c0_11] : memref<4x1xf32, #tpu.memory_space<vmem>>, vector<4x1xf32>
    %cst_12 = arith.constant 0.000000e+00 : f32
    %32 = vector.shape_cast %31 : vector<4x1xf32> to vector<4x1xf32>
    %33 = vector.broadcast %32 : vector<4x1xf32> to vector<4x256xf32>
    %34 = vector.broadcast %cst_12 : f32 to vector<4x256xf32>
    %35 = arith.select %23, %33, %34 : vector<4x256xi1>, vector<4x256xf32>
    %cst_13 = arith.constant dense<0.000000e+00> : vector<256xf32>
    %36 = vector.multi_reduction <add>, %35, %cst_13 [0] : vector<4x256xf32> to vector<256xf32>
    %37 = vector.shape_cast %36 : vector<256xf32> to vector<1x256xf32>
    %cst_14 = arith.constant 0.000000e+00 : f32
    %38 = vector.broadcast %cst_14 : f32 to vector<1x256xf32>
    %39 = arith.subf %38, %37 : vector<1x256xf32>
    %40 = arith.mulf %39, %30 : vector<1x256xf32>
    %41 = math.exp %30 : vector<1x256xf32>
    %cst_15 = arith.constant 1.000000e+00 : f32
    %42 = vector.broadcast %cst_15 : f32 to vector<1x256xf32>
    %43 = arith.subf %42, %41 : vector<1x256xf32>
    %44 = arith.mulf %43, %43 : vector<1x256xf32>
    %45 = arith.mulf %44, %40 : vector<1x256xf32>
    %cst_16 = arith.constant 0.000000e+00 : f32
    %46 = vector.broadcast %cst_16 : f32 to vector<1x256xf32>
    %47 = arith.select %12, %45, %46 : vector<1x256xi1>, vector<1x256xf32>
    %48 = tpu.iota {dimensions = array<i32: 2>} : vector<1x1x2x128xi32>
    %c0_i32 = arith.constant 0 : i32
    %49 = vector.broadcast %c0_i32 : i32 to vector<1x1x2x128xi32>
    %50 = arith.cmpi eq, %48, %49 : vector<1x1x2x128xi32>
    %51 = vector.shape_cast %47 : vector<1x256xf32> to vector<1x1x256xf32>
    %cst_17 = arith.constant dense<0.000000e+00> : vector<1xf32>
    %52 = vector.multi_reduction <add>, %51, %cst_17 [1, 2] : vector<1x1x256xf32> to vector<1xf32>
    %53 = vector.shape_cast %52 : vector<1xf32> to vector<1x1x1xf32>
    %54 = vector.extract %53[0, 0, 0] : f32 from vector<1x1x1xf32>
    %55 = arith.extui %12 : vector<1x256xi1> to vector<1x256xi32>
    %56 = arith.sitofp %55 : vector<1x256xi32> to vector<1x256xf32>
    %57 = vector.shape_cast %56 : vector<1x256xf32> to vector<1x1x256xf32>
    %cst_18 = arith.constant dense<0.000000e+00> : vector<1xf32>
    %58 = vector.multi_reduction <add>, %57, %cst_18 [1, 2] : vector<1x1x256xf32> to vector<1xf32>
    %59 = vector.shape_cast %58 : vector<1xf32> to vector<1x1x1xf32>
    %60 = vector.extract %59[0, 0, 0] : f32 from vector<1x1x1xf32>
    %61 = vector.broadcast %54 : f32 to vector<1x1x2x128xf32>
    %62 = vector.broadcast %60 : f32 to vector<1x1x2x128xf32>
    %63 = arith.select %50, %61, %62 : vector<1x1x2x128xi1>, vector<1x1x2x128xf32>
    %c0_19 = arith.constant 0 : index
    %c0_20 = arith.constant 0 : index
    %c0_21 = arith.constant 0 : index
    %c0_22 = arith.constant 0 : index
    %64 = vector.load %arg5[%c0_19, %c0_20, %c0_21, %c0_22] : memref<1x1x2x128xf32, #tpu.memory_space<vmem>>, vector<1x1x2x128xf32>
    tpu.vector_store %arg5[%c0_19, %c0_20, %c0_21, %c0_22], %63 {strides = array<i32>} : memref<1x1x2x128xf32, #tpu.memory_space<vmem>>, vector<1x1x2x128xf32>,
    return
  }
  func.func @transform_0(%arg0: i32, %arg1: i32) -> (i32, i32, i32) {
    %c0_i32 = arith.constant 0 : i32
    %c0_i32_0 = arith.constant 0 : i32
    return %arg0, %c0_i32, %arg1 : i32, i32, i32
  }
  func.func @transform_1(%arg0: i32, %arg1: i32) -> (i32, i32, i32) {
    %c0_i32 = arith.constant 0 : i32
    %c0_i32_0 = arith.constant 0 : i32
    return %arg0, %c0_i32, %arg1 : i32, i32, i32
  }
  func.func @transform_2(%arg0: i32, %arg1: i32) -> (i32, i32) {
    %c0_i32 = arith.constant 0 : i32
    %c0_i32_0 = arith.constant 0 : i32
    %c0_i32_1 = arith.constant 0 : i32
    return %c0_i32, %c0_i32_0 : i32, i32
  }
  func.func @transform_3(%arg0: i32, %arg1: i32) -> (i32, i32, i32, i32) {
    %c0_i32 = arith.constant 0 : i32
    %c0_i32_0 = arith.constant 0 : i32
    %c0_i32_1 = arith.constant 0 : i32
    return %arg0, %arg1, %c0_i32, %c0_i32_0 : i32, i32, i32, i32
  }
}

</mosaic_0001>

<bundles_post_ra>
// kernel: tpu_custom_call.1
= control target key start
LH: loop header
LB: loop body
LE: loop exit
PB: predicated region body
PF: predicated region fallthrough
CT: control target
= control target key end

     0   :  { %8 = vsyncpa [#allocation3], 0  ;;  %s949_s0 = inlined_call_operand.hbm [shape: f32[2,4,256], index: 0, kind: input, shape index: {}]   ;;  %s950_s1 = inlined_call_operand.vmem [shape: s32[2,1,256], index: 1, kind: input, shape index: {}]   ;;  %s951_s2 = inlined_call_operand.vmem [shape: f32[4,1], index: 2, kind: input, shape index: {}]   ;;  %s952_s3 = inlined_call_operand.hbm [shape: f32[2,1,2,128], index: 3, kind: output, shape index: {}]  }
   0x1   :  { %10 = vsyncpa [#allocation3 + $0x1], 0 }
   0x2   :  { %11 = vsyncpa [#allocation4], 0 }
   0x3   :  { %13 = vsyncpa [#allocation4 + $0x1], 0  ;;  %s764_s12 = smov 0   ;;  %s766_s13 = smov 0  }
   0x4   :  { %s768_s14 = smov 0   ;;  %s770_s15 = smov 0  }
   0x5   :  { %s772_s16 = smov 0   ;;  %s774_s17 = smov 0  }
   0x6 LB: > { %s531_s18 = sadd.s32 4294967295, %s740_s17   ;;  %s532_s19 = sadd.s32 4294967294, %s740_s17   ;;  %s740_s17 = sphi %s774_s17, %s19_s17   ;;  %s736_s16 = sphi %s772_s16, %s969_s16   ;;  %s732_s15 = sphi %s770_s15, %s968_s15   ;;  %s728_s14 = sphi %s768_s14, %s967_s14   ;;  %s724_s13 = sphi %s766_s13, %s966_s13   ;;  %s720_s12 = sphi %s764_s12, %s965_s12  }
   0x7   : > { %s31_s20 = sadd.s32 1, %s736_s16  ;;  %s40_s21 = sadd.s32 1, %s728_s14 }
   0x8   : > { %p33_p0 = scmp.ge.s32.totalorder %s31_s20, 2  ;;  %p47_p1 = scmp.ne.s32.totalorder %s728_s14, %s724_s13 }
   0x9   : > { %p48_p2 = scmp.eq.s32.totalorder %s740_s17, 0  ;;  %p53_p3 = scmp.ne.s32.totalorder %s724_s13, %s720_s12 }
   0xa   : > { %s971_s20 = smov (%p33_p0, %s31_s20), 0  ;;  %p54_p5 = scmp.eq.s32.totalorder %s531_s18, 0 }
   0xb   : > { %p805_p4 = por %p48_p2, %p47_p1  ;;  %s35_s23 = ssub.s32 %s736_s16, %s971_s20 }
   0xc   : > { %p128_p6 = scmp.eq.s32.totalorder %s531_s18, 1  ;;  %p38_p7 = scmp.eq.s32.totalorder %s35_s23, 0 }
   0xd   : > { %p811_p8 = por %p54_p5, %p53_p3  ;;  %p134_p10 = scmp.eq.s32.totalorder %s532_s19, 1 }
   0xe   : > { %p815_p9 = por %p128_p6, %p47_p1  ;;  %p534_p12 = scmp.ge.s32.totalorder %s740_s17, 2 }
   0xf   : > { %s820_s26 = scalar_select %p38_p7, %s728_s14, %s40_s21  }
  0x10   : > { %p822_p11 = por %p134_p10, %p53_p3  ;;  %p565_p13 = scmp.lt.s32.totalorder %s740_s17, 2 }
  0x11   : > { %s157_s28 = sand.u32 1, %s728_s14   ;;  %s548_s30 = sshll.u32 %s736_s16, 3 }
  0x12   : > { %s535_s29 = sshll.u32 %s157_s28, 3  ;;  %s168_s6 = scalar_lea.hbm %s949_s0, %s548_s30 }
  0x13   : > { %s161_s7 = scalar_lea.vmem [#allocation2], %s535_s29  ;;  %s170_s9 = sshll.u32 %s168_s6, 4  ;;  %s171_s9 = int_to_ptr.hbm [resolvable:$true] %s170_s9 }
  0x14   : > { %s172_s8 = sshll.u32 %s161_s7, 4  ;;  %p558_p0 = pnand %p565_p13, %p805_p4  ;;  %s173_s8 = int_to_ptr.vmem [resolvable:$true] %s172_s8 }
  0x15   : > { %p538_p1 = scmp.ge.s32.totalorder %s740_s17, 1  ;;  %p189_p2 = scmp.lt.s32.totalorder %s740_s17, 3 }
  0x16   : > { %s158_s10 = scalar_lea.sflag [#allocation3], %s157_s28 }
  0x17   : > { %560 = dma.hbm_to_vmem [thread:$0]  (!%p558_p0), %s171_s9, 128, %s173_s8, %s158_s10  }
  0x18   : > { %p190_p3 = pnand %p538_p1, %p189_p2 }
  0x19   : > { %s838_s11 = sand.u32 (!%p190_p3), 1, %s724_s13  }
  0x1a   : > { %193 = sbr.rel (%p190_p3) target bundleno = 357 (0x165), region = 32  ;;  %s539_s18 = sshll.u32 (!%p190_p3), %s838_s11, 3 }
  0x1b   : > { %s196_s19 = scalar_lea.sflag (!%p190_p3), [#allocation3], %s838_s11  ;;  %s199_s21 = scalar_lea.vmem (!%p190_p3), [#allocation2], %s539_s18 }
  0x1f   : > { %711 = dma.done.wait (%p811_p8), %s196_s19, 128  }
  0x20   : > { %713 = vsyncadd (%p811_p8), %s196_s19, 4294967168  ;;  %v742_v0 = vmov 0   ;;  %v345_v1 = vld [vmem:[%s951_s2] sm:$0xf]  ;;  %v241_v2 = vld [vmem:[%s199_s21] sm:$0xff]  ;;  %vm266_vm0 = vcmask 1043456   ;;  %v313_v26 = vlaneseq }
  0x21   : > { %617 = vset.pattern.permute.xlu0 %v742_v0  ;;  %261 = vst [vmem:[#allocation1] ss:$2 sm:$0xff] %v241_v2  ;;  %p233_p4 = scmp.lt.s32.totalorder %s732_s15, 1  ;;  %vm384_vm6 = vcmask 1040384   ;;  %s540_s5 = sshll.u32 %s838_s11, 1 }
  0x22   : > { %348 = vperm.xlu0 %617, %v345_v1   ;;  %v860_v30 = vshrl.u32 %v313_v26, 7  ;;  %s545_s6 = sshll.u32 %s732_s15, 1  ;;  %s230_s10 = scalar_lea.vmem [#allocation5], %s540_s5 }
  0x23   : > { %s234_s24 = scalar_select %p233_p4, %s732_s15, 1 }
  0x24   : > { %s429_s9 = scalar_lea.hbm %s952_s3, %s545_s6  ;;  %s431_s18 = sshll.u32 %s230_s10, 4  ;;  %vm383_vm7 = vcmp.eq.s32.totalorder %v860_v30, 0  ;;  %s432_s18 = int_to_ptr.vmem [resolvable:$true] %s431_s18 }
  0x25   : > { %s541_s28 = sshll.u32 %s234_s24, 1  ;;  %s433_s19 = sshll.u32 %s429_s9, 4  ;;  %s434_s19 = int_to_ptr.hbm [resolvable:$true] %s433_s19 }
  0x26   : > { %s239_s4 = scalar_lea.vmem %s950_s1, %s541_s28  ;;  %s418_s23 = scalar_lea.sflag [#allocation4], %s838_s11 }
  0x27   : > { %v242_v28 = vld [vmem:[%s239_s4] sm:$0x3]  ;;  %s672_s15 = sshra.s32 %s434_s19, 4  ;;  %s678_s30 = scalar_lea.hbm %s952_s3, 4  ;;  %s673_s15 = int_to_ptr.hbm [resolvable:$true] %s672_s15 }
  0x28   : > { %v263_v3 = vld.sshfl [vmem:[#allocation1 + $0x8] sm:$0xff pattern:$0x75316420]  ;;  %v262_v5 = vld.sshfl [vmem:[#allocation1] sm:$0xff pattern:$0x75316420]  ;;  %p679_p8 = scmp.lt.s32.totalorder %s673_s15, %s952_s3 }
  0x29   : > { %v274_v4 = vsel %vm266_vm0, %v263_v3, -inf  ;;  %v267_v7 = vsel %vm266_vm0, %v262_v5, -inf  ;;  %v315_v32 = vperm.slane %v242_v28, 0  ;;  %v316_v33 = vperm.slane %v242_v28, 1  ;;  %s674_s24 = scalar_lea.hbm %s673_s15, 2 }
  0x2a   : > { %v275_v6 = vrot.slane %v274_v4, 4  ;;  %v268_v8 = vrot.slane %v267_v7, 4  ;;  %vm252_vm3 = vcmp.ne.s32.totalorder %v242_v28, 4294967196  ;;  %p675_p5 = scmp.ne.s32.totalorder %s673_s15, %s674_s24  ;;  %p680_p10 = scmp.lt.s32.totalorder %s678_s30, %s674_s24 }
  0x2b   : > { %vm863_vm1 = vcmp.eq.s32.totalorder %v860_v30, %v315_v32  ;;  %vm868_vm2 = vcmp.eq.s32.totalorder %v860_v30, %v316_v33  ;;  %v253_v58 = vsel %vm252_vm3, 1, %v742_v0  ;;  %v743_v0 = vmov 0.0  }
  0x2c   : > { %v276_v9 = vmax.f32 %v274_v4, %v275_v6  ;;  %v269_v10 = vmax.f32 %v267_v7, %v268_v8  ;;  %v254_v60 = vperm.slane %v253_v58, 0  ;;  %v255_v61 = vperm.slane %v253_v58, 1  ;;  %p676_p6 = pnand %p675_p5, %p815_p9  ;;  %p681_p13 = por %p680_p10, %p679_p8 }
  0x2e   : > { %v277_v11 = vrot.slane %v276_v9, 2  ;;  %v270_v12 = vrot.slane %v269_v10, 2  ;;  %vm879_vm4 = vcmp.ne.s32.totalorder %v254_v60, 0  ;;  %vm883_vm5 = vcmp.ne.s32.totalorder %v255_v61, 0  ;;  %p677_p7 = pneg %p676_p6 }
  0x2f   : > { %v542_v6 = vsel %vm879_vm4, 1.0, %v743_v0  ;;  %v543_v7 = vsel %vm883_vm5, 1.0, %v743_v0 }
  0x30   : > { %v278_v13 = vmax.f32 %v276_v9, %v277_v11  ;;  %v271_v14 = vmax.f32 %v269_v10, %v270_v12  ;;  %v401_v9 = vsel %vm384_vm6, %v542_v6, 0.0  ;;  %v402_v10 = vsel %vm384_vm6, %v543_v7, 0.0  ;;  %p682_p0 = pnand %p681_p13, %p677_p7 }
  0x31   : > { %v403_v11 = vadd.f32 %v402_v10, %v401_v9 }
  0x32   : > { %v279_v15 = vrot.slane %v278_v13, 1  ;;  %v272_v16 = vrot.slane %v271_v14, 1 }
  0x33   : > { %404 = vadd.xlane.f32.xlu1 %v403_v11 }
  0x34   : > { %v280_v17 = vmax.f32 %v278_v13, %v279_v15  ;;  %v273_v18 = vmax.f32 %v271_v14, %v272_v16 }
  0x36   : > { %v283_v19 = vrot.slane %v280_v17, 4 }
  0x38   : > { %v284_v20 = vsel %vm266_vm0, %v273_v18, %v283_v19 }
  0x39   : > { %v286_v21 = vsub.f32 %v241_v2, %v284_v20 }
  0x3b   : > { %v287_v22 = vmul.f32 1.442695, %v286_v21 }
  0x3d   : > { %618 = vpow2.f32 %v287_v22 }
  0x43   : > { %v619_v23 = vpop.eup %618 }
  0x44   : > { %290 = vst [vmem:[#allocation1] ss:$2 sm:$0xff] %v619_v23 }
  0x4b   : > { %v291_v24 = vld.sshfl [vmem:[#allocation1] sm:$0xff pattern:$0x75316420]  ;;  %v292_v25 = vld.sshfl [vmem:[#allocation1 + $0x8] sm:$0xff pattern:$0x75316420] }
  0x4c   : > { %320 = vst [vmem:[#allocation1] ss:$2 sm:$0xff] %v286_v21  ;;  %v295_v27 = vsel %vm266_vm0, %v291_v24, 0.0  ;;  %v302_v29 = vsel %vm266_vm0, %v292_v25, 0.0 }
  0x4d   : > { %v296_v31 = vrot.slane %v295_v27, 4  ;;  %v303_v34 = vrot.slane %v302_v29, 4 }
  0x4f   : > { %v297_v37 = vadd.f32 %v296_v31, %v295_v27  ;;  %v304_v40 = vadd.f32 %v303_v34, %v302_v29 }
  0x51   : > { %v298_v43 = vrot.slane %v297_v37, 2  ;;  %v305_v44 = vrot.slane %v304_v40, 2 }
  0x53   : > { %v321_v36 = vld.sshfl [vmem:[#allocation1] sm:$0xff pattern:$0x75316420]  ;;  %v322_v39 = vld.sshfl [vmem:[#allocation1 + $0x8] sm:$0xff pattern:$0x75316420]  ;;  %v299_v47 = vadd.f32 %v298_v43, %v297_v37  ;;  %v306_v49 = vadd.f32 %v305_v44, %v304_v40 }
  0x54   : > { %v325_v41 = vsel %vm863_vm1, %v321_v36, 0.0  ;;  %v326_v42 = vsel %vm868_vm2, %v322_v39, 0.0 }
  0x55   : > { %v327_v45 = vsel %vm266_vm0, %v325_v41, 0.0  ;;  %v334_v46 = vsel %vm266_vm0, %v326_v42, 0.0  ;;  %v300_v51 = vrot.slane %v299_v47, 1  ;;  %v307_v53 = vrot.slane %v306_v49, 1 }
  0x56   : > { %v328_v48 = vrot.slane %v327_v45, 4  ;;  %v335_v50 = vrot.slane %v334_v46, 4 }
  0x57   : > { %v301_v55 = vadd.f32 %v300_v51, %v299_v47  ;;  %v308_v57 = vadd.f32 %v307_v53, %v306_v49 }
  0x58   : > { %v329_v52 = vadd.f32 %v328_v48, %v327_v45  ;;  %v336_v54 = vadd.f32 %v335_v50, %v334_v46 }
  0x59   : > { %620 = vlog2.f32 %v301_v55 }
  0x5a   : > { %v330_v56 = vrot.slane %v329_v52, 2  ;;  %v337_v59 = vrot.slane %v336_v54, 2  ;;  %622 = vlog2.f32 %v308_v57 }
  0x5c   : > { %v331_v62 = vadd.f32 %v330_v56, %v329_v52  ;;  %v338_v63 = vadd.f32 %v337_v59, %v336_v54 }
  0x5e   : > { %v332_v3 = vrot.slane %v331_v62, 1  ;;  %v339_v5 = vrot.slane %v338_v63, 1 }
  0x5f   : > { %v621_v4 = vpop.eup %620 }
  0x60   : > { %v623_v8 = vpop.eup %622  ;;  %v333_v12 = vadd.f32 %v332_v3, %v331_v62  ;;  %v310_v13 = vmul.f32 0.6931472, %v621_v4  ;;  %v340_v14 = vadd.f32 %v339_v5, %v338_v63 }
  0x61   : > { %v312_v15 = vmul.f32 0.6931472, %v623_v8 }
  0x62   : > { %v341_v16 = vsub.f32 %v333_v12, %v310_v13 }
  0x63   : > { %v342_v17 = vsub.f32 %v340_v14, %v312_v15 }
  0x64   : > { %v343_v18 = vsel %vm879_vm4, %v341_v16, -1.0 }
  0x65   : > { %v344_v19 = vsel %vm883_vm5, %v342_v17, -1.0  ;;  %v371_v20 = vmul.f32 1.442695, %v343_v18 }
  0x66   : > { %v373_v21 = vmul.f32 1.442695, %v344_v19 }
  0x67   : > { %624 = vpow2.f32 %v371_v20 }
  0x68   : > { %626 = vpow2.f32 %v373_v21 }
  0x6d   : > { %v625_v32 = vpop.eup %624 }
  0x6e   : > { %v627_v36 = vpop.eup %626  ;;  %v375_v38 = vsub.f32 1.0, %v625_v32 }
  0x6f   : > { %v376_v41 = vsub.f32 1.0, %v627_v36 }
  0x70   : > { %v377_v46 = vmul.f32 %v375_v38, %v375_v38 }
  0x71   : > { %v378_v47 = vmul.f32 %v376_v41, %v376_v41 }
  0x94   : > { %v349_v22 = vpop.permute.xlu0 %348 }
  0x95   : > { %v351_v23 = vsel %vm863_vm1, %v349_v22, 0.0  ;;  %v352_v24 = vsel %vm868_vm2, %v349_v22, 0.0 }
  0x96   : > { %v353_v25 = vsel %vm266_vm0, %v351_v23, 0.0  ;;  %v360_v26 = vsel %vm266_vm0, %v352_v24, 0.0 }
  0x97   : > { %v354_v27 = vrot.slane %v353_v25, 4  ;;  %v361_v28 = vrot.slane %v360_v26, 4 }
  0x99   : > { %v355_v29 = vadd.f32 %v354_v27, %v353_v25  ;;  %v362_v31 = vadd.f32 %v361_v28, %v360_v26 }
  0x9b   : > { %v356_v33 = vrot.slane %v355_v29, 2  ;;  %v363_v34 = vrot.slane %v362_v31, 2 }
  0x9d   : > { %v357_v37 = vadd.f32 %v356_v33, %v355_v29  ;;  %v364_v35 = vadd.f32 %v363_v34, %v362_v31 }
  0x9f   : > { %v358_v39 = vrot.slane %v357_v37, 1  ;;  %v365_v40 = vrot.slane %v364_v35, 1 }
  0xa1   : > { %v359_v42 = vadd.f32 %v358_v39, %v357_v37  ;;  %v366_v43 = vadd.f32 %v365_v40, %v364_v35 }
  0xa3   : > { %v367_v44 = vsub.f32 0.0, %v359_v42  ;;  %v368_v45 = vsub.f32 0.0, %v366_v43 }
  0xa5   : > { %v369_v48 = vmul.f32 %v367_v44, %v343_v18  ;;  %v370_v49 = vmul.f32 %v368_v45, %v344_v19 }
  0xa6   : > { %v405_v57 = vpop.xlane.xlu1 %404 }
  0xa7   : > { %v379_v50 = vmul.f32 %v377_v46, %v369_v48  ;;  %v380_v51 = vmul.f32 %v378_v47, %v370_v49  ;;  %v406_v58 = vrot.slane %v405_v57, 4 }
  0xa9   : > { %v381_v52 = vsel %vm879_vm4, %v379_v50, 0.0  ;;  %v382_v53 = vsel %vm883_vm5, %v380_v51, 0.0  ;;  %v407_v59 = vadd.f32 %v406_v58, %v405_v57 }
  0xaa   : > { %v385_v54 = vsel %vm384_vm6, %v381_v52, 0.0  ;;  %v386_v55 = vsel %vm384_vm6, %v382_v53, 0.0 }
  0xab   : > { %v387_v56 = vadd.f32 %v386_v55, %v385_v54  ;;  %v408_v60 = vrot.slane %v407_v59, 2 }
  0xad   : > { %388 = vadd.xlane.f32.xlu0 %v387_v56  ;;  %v409_v1 = vadd.f32 %v408_v60, %v407_v59 }
  0xaf   : > { %v410_v2 = vrot.slane %v409_v1, 1 }
  0xb1   : > { %v411_v6 = vadd.f32 %v410_v2, %v409_v1 }
 0x120   : > { %v389_v61 = vpop.xlane.xlu0 %388 }
 0x121   : > { %v390_v62 = vrot.slane %v389_v61, 4 }
 0x123   : > { %v391_v63 = vadd.f32 %v390_v62, %v389_v61 }
 0x125   : > { %v392_v3 = vrot.slane %v391_v63, 2 }
 0x127   : > { %v393_v4 = vadd.f32 %v392_v3, %v391_v63 }
 0x129   : > { %v394_v5 = vrot.slane %v393_v4, 1 }
 0x12b   : > { %v395_v0 = vadd.f32 %v394_v5, %v393_v4 }
 0x12d   : > { %549 = vpush %v395_v0 }
 0x12e   : > { %551 = vpush %v411_v6 }
 0x15e   : > { %s550_s21 = spop %549 }
 0x15f   : > { %v413_v7 = vstv %s550_s21  ;;  %s552_s22 = spop %551 }
 0x160   : > { %v414_v8 = vstv %s552_s22 }
 0x161   : > { %v415_v9 = vsel %vm383_vm7, %v413_v7, %v414_v8 }
 0x162   : > { %416 = vst [vmem:[%s230_s10] sm:$0x3] %v415_v9 }
 0x163   : > { %685 = shalt.err (!%p682_p0)
}
 0x164   : > { %555 = dma.vmem_to_hbm [thread:$0]  (%p815_p9), %s432_s18, 32, %s434_s19, %s418_s23  }
 0x165 PF: > { %s445_s11 = sand.u32 1, %s720_s12   ;;  %p562_p1 = pnand %p534_p12, %p822_p11 }
 0x166   : > { %s446_s6 = scalar_lea.sflag [#allocation4], %s445_s11 }
 0x167   : > { %p563_p2 = pneg %p562_p1 }
 0x169   : > { %715 = dma.done.wait (%p563_p2), %s446_s6, 32  }
 0x16a   : > { %717 = vsyncadd (%p563_p2), %s446_s6, 4294967264  ;;  %s19_s17 = sadd.s32 1, %s740_s17   ;;  %s965_s12 = smov %s724_s13 }
 0x16b   : > { %p16_p3 = scmp.ge.s32.totalorder %s19_s17, 4   ;;  %s966_s13 = smov %s728_s14 }
 0x16c   : > { %s967_s14 = smov %s820_s26  ;;  %s968_s15 = smov %s736_s16 }
 0x16d   : > { %s969_s16 = smov %s971_s20  ;;  %18 = sbr.rel (!%p16_p3) target bundleno = 6 (0x6), region = 80 }
 0x172   :  { %452 = vsyncpa [#allocation3], 1 }
 0x173   :  { %454 = vsyncpa [#allocation3 + $0x1], 1 }
 0x174   :  { %455 = vsyncpa [#allocation4], 1 }
 0x175   :  { %457 = vsyncpa [#allocation4 + $0x1], 1 }

</bundles_post_ra>
